<compile_context>
chip_gen: v7x
topology: tpu7x:2x2x1
jax: 0.10.0
libtpu: 0.0.40
codegen_flags: <defaults>
</compile_context>

<pallas_src>
import jax
import jax.numpy as jnp
from jax.experimental import pallas as pl
from jax.experimental.pallas import tpu as pltpu

LANE = 128
DEFAULT_BLOCK_ROWS = 8192       # 8192 rows * 128 lanes * 4 B = 4 MiB per f32 block
MAX_SAMPLES_PER_BLOCK = 512     # bounds VMEM padding of the (sp,1,1) scalar blocks
MIN_GRID_STEPS = 4              # enough steps for v7x megacore + pipelining


def _normalize_kernel(x_ref, inv_ref, bias_ref, o_ref):
    # x_ref: (sp, rb, 128); inv_ref/bias_ref: (sp, 1, 1) broadcast over the block.
    x = x_ref[...].astype(jnp.float32)
    o_ref[...] = (x * inv_ref[...] + bias_ref[...]).astype(o_ref.dtype)


def _round_up(v, m):
    return ((v + m - 1) // m) * m


def _choose_tiling(n, r, block_rows):
    """Pick (samples_per_block, rows_per_block) for an (n, r, 128) array."""
    block_rows = max(8, _round_up(block_rows, 8))
    r8 = max(8, _round_up(r, 8))                     # sublane-padded rows / sample
    if r <= block_rows:
        # Batch whole samples into one block.
        sp = max(1, min(n, block_rows // r8, MAX_SAMPLES_PER_BLOCK))
        if pl.cdiv(n, sp) < MIN_GRID_STEPS:
            sp = max(1, pl.cdiv(n, MIN_GRID_STEPS))
            if sp == 1 and n < MIN_GRID_STEPS and r >= 8 * MIN_GRID_STEPS:
                # Too few samples: split rows instead so the grid still has
                # enough steps to pipeline / shard across TensorCores.
                rb = max(8, _round_up(pl.cdiv(r, pl.cdiv(MIN_GRID_STEPS, n)), 8))
                return 1, min(rb, block_rows)
        return sp, r
    # Large per-sample slab: one sample per block, split along rows.
    rb = block_rows
    if n * pl.cdiv(r, rb) < MIN_GRID_STEPS:
        rb = max(8, _round_up(pl.cdiv(r, pl.cdiv(MIN_GRID_STEPS, n)), 8))
        rb = min(rb, block_rows)
    return 1, rb


def normalize(x, mean, std, *, block_rows=DEFAULT_BLOCK_ROWS):
    """x: [N, ...] (e.g. [N, C, H, W]); mean, std: [N]. Returns same shape/dtype as x."""
    n = x.shape[0]
    f = 1
    for d in x.shape[1:]:
        f *= d

    r = pl.cdiv(f, LANE)
    f_pad = r * LANE

    x2 = x.reshape(n, f)
    if f_pad != f:
        # Fallback only when the per-sample size is not a multiple of 128.
        x2 = jnp.pad(x2, ((0, 0), (0, f_pad - f)))
    x3 = x2.reshape(n, r, LANE)

    inv = (1.0 / jnp.asarray(std, dtype=jnp.float32)).reshape(n, 1, 1)
    bias = (-jnp.asarray(mean, dtype=jnp.float32).reshape(n, 1, 1)) * inv

    sp, rb = _choose_tiling(n, r, block_rows)
    grid = (pl.cdiv(n, sp), pl.cdiv(r, rb))

    x_blk = (sp, rb, LANE)
    s_blk = (sp, 1, 1)

    # VMEM budget: in + out x-blocks and the two scalar blocks, double-buffered.
    itemsize = jnp.dtype(x.dtype).itemsize
    x_block_bytes = sp * rb * LANE * itemsize
    s_block_bytes = sp * 8 * LANE * 4            # (sp,1,1) f32 pads to (sp,8,128)
    working = 4 * x_block_bytes + 4 * s_block_bytes
    vmem_limit = int(min(56 * 1024 * 1024,
                         max(32 * 1024 * 1024, working + (4 << 20))))

    out3 = pl.pallas_call(
        _normalize_kernel,
        out_shape=jax.ShapeDtypeStruct((n, r, LANE), x.dtype),
        grid=grid,
        in_specs=[
            pl.BlockSpec(x_blk, lambda i, j: (i, j, 0)),
            pl.BlockSpec(s_blk, lambda i, j: (i, 0, 0)),
            pl.BlockSpec(s_blk, lambda i, j: (i, 0, 0)),
        ],
        out_specs=pl.BlockSpec(x_blk, lambda i, j: (i, j, 0)),
        compiler_params=pltpu.CompilerParams(
            dimension_semantics=("parallel", "parallel"),
            vmem_limit_bytes=vmem_limit,
        ),
    )(x3, inv, bias)

    if f_pad != f:
        out = out3.reshape(n, f_pad)[:, :f]
    else:
        out = out3
    return out.reshape(x.shape)


def normalize_ref(x, mean, std):
    # Pure-JAX reference mirroring the PyTorch per-sample loop.
    n = x.shape[0]
    bshape = (n,) + (1,) * (x.ndim - 1)
    return (x - mean.reshape(bshape)) / std.reshape(bshape)


def _check(x, mean, std, **kw):
    out = jax.block_until_ready(normalize(x, mean, std, **kw))
    ref = normalize_ref(x, mean, std)
    assert out.shape == x.shape and out.dtype == x.dtype
    assert jnp.allclose(out, ref, atol=1e-5, rtol=1e-5)
    return out


if __name__ == "__main__":
    key = jax.random.PRNGKey(0)

    # 1) Primary case (matches the module spec): [2, 4, 16, 16].
    kx, km, ks, key = jax.random.split(key, 4)
    x = jax.random.normal(kx, (2, 4, 16, 16), dtype=jnp.float32)
    mean = jax.random.normal(km, (2,), dtype=jnp.float32) * 0.5
    std = jnp.abs(jax.random.normal(ks, (2,), dtype=jnp.float32)) + 0.5
    _check(x, mean, std)

    # 2) Multi-sample-per-block path (sp > 1) with a ragged last sample block.
    kx, km, ks, key = jax.random.split(key, 4)
    x = jax.random.normal(kx, (10, 4, 16, 16), dtype=jnp.float32)
    mean = jax.random.normal(km, (10,), dtype=jnp.float32) * 0.5
    std = jnp.abs(jax.random.normal(ks, (10,), dtype=jnp.float32)) + 0.5
    _check(x, mean, std)

    # 3) Fallback pad path (per-sample size not a multiple of 128).
    kx, km, ks, key = jax.random.split(key, 4)
    x = jax.random.normal(kx, (3, 3, 5, 7), dtype=jnp.float32)
    mean = jax.random.normal(km, (3,), dtype=jnp.float32) * 0.5
    std = jnp.abs(jax.random.normal(ks, (3,), dtype=jnp.float32)) + 0.5
    _check(x, mean, std)

    # 4) Row-splitting path (sample larger than the block).
    kx, km, ks, key = jax.random.split(key, 4)
    x = jax.random.normal(kx, (2, 4, 32, 32), dtype=jnp.float32)
    mean = jax.random.normal(km, (2,), dtype=jnp.float32) * 0.5
    std = jnp.abs(jax.random.normal(ks, (2,), dtype=jnp.float32)) + 0.5
    _check(x, mean, std, block_rows=8)

    print("KERNEL_OK")
</pallas_src>

<mosaic_0001>
module attributes {stable_mosaic.version = 11 : i64} {
  func.func @_normalize_kernel(%arg0: i32, %arg1: i32, %arg2: memref<1x8x128xf32, #tpu.memory_space<vmem>>, %arg3: memref<1x1x1xf32, #tpu.memory_space<vmem>>, %arg4: memref<1x1x1xf32, #tpu.memory_space<vmem>>, %arg5: memref<1x8x128xf32, #tpu.memory_space<vmem>>) attributes {dimension_semantics = [#tpu.dimension_semantics<parallel>, #tpu.dimension_semantics<parallel>], iteration_bounds = array<i64: 2, 1>, scalar_prefetch = 0 : i64, scratch_operands = 0 : i64, tpu.core_type = #tpu.core_type<tc>, window_params = [{transform_indices = @transform_0, window_bounds = array<i64: 1, 8, 128>}, {transform_indices = @transform_1, window_bounds = array<i64: 1, 1, 1>}, {transform_indices = @transform_2, window_bounds = array<i64: 1, 1, 1>}, {transform_indices = @transform_3, window_bounds = array<i64: 1, 8, 128>}]} {
    %c0 = arith.constant 0 : index
    %c0_0 = arith.constant 0 : index
    %c0_1 = arith.constant 0 : index
    %0 = vector.load %arg2[%c0, %c0_0, %c0_1] : memref<1x8x128xf32, #tpu.memory_space<vmem>>, vector<1x8x128xf32>
    %c0_2 = arith.constant 0 : index
    %c0_3 = arith.constant 0 : index
    %c0_4 = arith.constant 0 : index
    %1 = vector.load %arg3[%c0_2, %c0_3, %c0_4] : memref<1x1x1xf32, #tpu.memory_space<vmem>>, vector<1x1x1xf32>
    %2 = vector.broadcast %1 : vector<1x1x1xf32> to vector<1x8x128xf32>
    %3 = arith.mulf %0, %2 : vector<1x8x128xf32>
    %c0_5 = arith.constant 0 : index
    %c0_6 = arith.constant 0 : index
    %c0_7 = arith.constant 0 : index
    %4 = vector.load %arg4[%c0_5, %c0_6, %c0_7] : memref<1x1x1xf32, #tpu.memory_space<vmem>>, vector<1x1x1xf32>
    %5 = vector.broadcast %4 : vector<1x1x1xf32> to vector<1x8x128xf32>
    %6 = arith.addf %3, %5 : vector<1x8x128xf32>
    %c0_8 = arith.constant 0 : index
    %c0_9 = arith.constant 0 : index
    %c0_10 = arith.constant 0 : index
    %7 = vector.load %arg5[%c0_8, %c0_9, %c0_10] : memref<1x8x128xf32, #tpu.memory_space<vmem>>, vector<1x8x128xf32>
    tpu.vector_store %arg5[%c0_8, %c0_9, %c0_10], %6 {strides = array<i32>} : memref<1x8x128xf32, #tpu.memory_space<vmem>>, vector<1x8x128xf32>,
    return
  }
  func.func @transform_0(%arg0: i32, %arg1: i32) -> (i32, i32, i32) {
    %c0_i32 = arith.constant 0 : i32
    %c0_i32_0 = arith.constant 0 : i32
    return %arg0, %arg1, %c0_i32 : i32, i32, i32
  }
  func.func @transform_1(%arg0: i32, %arg1: i32) -> (i32, i32, i32) {
    %c0_i32 = arith.constant 0 : i32
    %c0_i32_0 = arith.constant 0 : i32
    %c0_i32_1 = arith.constant 0 : i32
    return %arg0, %c0_i32, %c0_i32_0 : i32, i32, i32
  }
  func.func @transform_2(%arg0: i32, %arg1: i32) -> (i32, i32, i32) {
    %c0_i32 = arith.constant 0 : i32
    %c0_i32_0 = arith.constant 0 : i32
    %c0_i32_1 = arith.constant 0 : i32
    return %arg0, %c0_i32, %c0_i32_0 : i32, i32, i32
  }
  func.func @transform_3(%arg0: i32, %arg1: i32) -> (i32, i32, i32) {
    %c0_i32 = arith.constant 0 : i32
    %c0_i32_0 = arith.constant 0 : i32
    return %arg0, %arg1, %c0_i32 : i32, i32, i32
  }
}

</mosaic_0001>

<bundles_post_ra>
// kernel: tpu_custom_call.1
= control target key start
LH: loop header
LB: loop body
LE: loop exit
PB: predicated region body
PF: predicated region fallthrough
CT: control target
= control target key end

     0   :  { %8 = vsyncpa [#allocation3], 0  ;;  %s764_s0 = inlined_call_operand.hbm [shape: f32[2,8,128], index: 0, kind: input, shape index: {}]   ;;  %s765_s1 = inlined_call_operand.vmem [shape: f32[2,1,1], index: 1, kind: input, shape index: {}]   ;;  %s766_s2 = inlined_call_operand.vmem [shape: f32[2,1,1], index: 2, kind: input, shape index: {}]   ;;  %s767_s3 = inlined_call_operand.hbm [shape: f32[2,8,128], index: 3, kind: output, shape index: {}]  }
   0x1   :  { %10 = vsyncpa [#allocation3 + $0x1], 0 }
   0x2   :  { %11 = vsyncpa [#allocation4], 0 }
   0x3   :  { %13 = vsyncpa [#allocation4 + $0x1], 0  ;;  %s584_s12 = smov 0   ;;  %s586_s13 = smov 0  }
   0x4   :  { %s588_s14 = smov 0   ;;  %s590_s15 = smov 0  }
   0x5   :  { %s592_s16 = smov 0   ;;  %s594_s17 = smov 0  }
   0x6 LB: > { %s368_s18 = sadd.s32 4294967295, %s559_s17   ;;  %s369_s19 = sadd.s32 4294967294, %s559_s17   ;;  %s559_s17 = sphi %s594_s17, %s19_s17   ;;  %s555_s16 = sphi %s592_s16, %s783_s16   ;;  %s551_s15 = sphi %s590_s15, %s782_s15   ;;  %s547_s14 = sphi %s588_s14, %s781_s14   ;;  %s543_s13 = sphi %s586_s13, %s780_s13   ;;  %s539_s12 = sphi %s584_s12, %s779_s12  }
   0x7   : > { %s31_s20 = sadd.s32 1, %s555_s16  ;;  %s40_s21 = sadd.s32 1, %s547_s14 }
   0x8   : > { %p33_p0 = scmp.ge.s32.totalorder %s31_s20, 2  ;;  %p47_p1 = scmp.ne.s32.totalorder %s547_s14, %s543_s13 }
   0x9   : > { %p48_p2 = scmp.eq.s32.totalorder %s559_s17, 0  ;;  %p53_p3 = scmp.ne.s32.totalorder %s543_s13, %s539_s12 }
   0xa   : > { %s785_s20 = smov (%p33_p0, %s31_s20), 0  ;;  %p54_p5 = scmp.eq.s32.totalorder %s368_s18, 0 }
   0xb   : > { %p625_p4 = por %p48_p2, %p47_p1  ;;  %s35_s23 = ssub.s32 %s555_s16, %s785_s20 }
   0xc   : > { %p131_p6 = scmp.eq.s32.totalorder %s368_s18, 1  ;;  %p38_p7 = scmp.eq.s32.totalorder %s35_s23, 0 }
   0xd   : > { %p631_p8 = por %p54_p5, %p53_p3  ;;  %p137_p10 = scmp.eq.s32.totalorder %s369_s19, 1 }
   0xe   : > { %p635_p9 = por %p131_p6, %p47_p1  ;;  %p395_p13 = scmp.lt.s32.totalorder %s559_s17, 2 }
   0xf   : > { %s640_s26 = scalar_select %p38_p7, %s547_s14, %s40_s21  }
  0x10   : > { %s771_s25 = scalar_select %p635_p9, 1, 0 }
  0x11   : > { %p642_p11 = por %p137_p10, %p53_p3  ;;  %s157_s28 = sand.u32 1, %s547_s14  }
  0x12   : > { %s372_s29 = sshll.u32 %s157_s28, 3  ;;  %s373_s30 = sshll.u32 %s555_s16, 7 }
  0x13   : > { %s772_s27 = scalar_select %p642_p11, 1, 0 }
  0x14   : > { %s653_s6 = scalar_lea.hbm %s764_s0, %s373_s30  ;;  %s161_s7 = scalar_lea.vmem [#allocation2], %s372_s29 }
  0x15   : > { %s169_s8 = sshll.u32 %s161_s7, 4  ;;  %p659_p0 = pnand %p395_p13, %p625_p4  ;;  %s655_s8 = int_to_ptr.vmem [resolvable:$true] %s169_s8 }
  0x16   : > { %s158_s10 = scalar_lea.sflag [#allocation3], %s157_s28  ;;  %s447_s11 = scalar_lea.hbm %s653_s6, 128 }
  0x17   : > { %p448_p3 = scmp.ne.s32.totalorder %s653_s6, %s447_s11  ;;  %p449_p5 = pneg %p659_p0 }
  0x18   : > { %s452_s21 = scalar_lea.hbm %s764_s0, 256  ;;  %p453_p4 = scmp.lt.u32.totalorder %s653_s6, %s764_s0 }
  0x19   : > { %p450_p6 = pnand %p449_p5, %p448_p3  ;;  %p454_p10 = scmp.lt.u32.totalorder %s452_s21, %s447_s11 }
  0x1a   : > { %p456_p12 = scmp.lt.u32.totalorder %s447_s11, %s653_s6 }
  0x1b   : > { %p451_p7 = pneg %p450_p6  ;;  %p455_p13 = por %p454_p10, %p453_p4 }
  0x1d   : > { %p457_p1 = por %p456_p12, %p455_p13 }
  0x1f   : > { %p458_p2 = pnand %p457_p1, %p451_p7 }
  0x21   : > { %461 = shalt.err (!%p458_p2)
}
  0x22   : > { %s462_s28 = scalar_lea.vmem %s655_s8, 128  ;;  %s561_s29 = smov [#allocation2]  }
  0x23   : > { %p463_p3 = scmp.ne.s32.totalorder %s655_s8, %s462_s28  ;;  %s467_s30 = sshll.u32 %s561_s29, 4  ;;  %s468_s30 = int_to_ptr.vmem [resolvable:$false] %s467_s30 }
  0x24   : > { %s469_s4 = scalar_lea.vmem %s468_s30, 256  ;;  %p470_p9 = scmp.lt.s32.totalorder %s655_s8, %s468_s30 }
  0x25   : > { %p465_p6 = pnand %p463_p3, %p449_p5  ;;  %p471_p4 = scmp.lt.s32.totalorder %s469_s4, %s462_s28 }
  0x27   : > { %p466_p11 = pneg %p465_p6  ;;  %p472_p10 = por %p471_p4, %p470_p9 }
  0x29   : > { %p473_p12 = pnand %p472_p10, %p466_p11 }
  0x2b   : > { %476 = shalt.err (!%p473_p12)
}
  0x2c   : > { %390 = dma.hbm_to_vmem [thread:$0]  (!%p659_p0), %s653_s6, 128, %s655_s8, %s158_s10  }
  0x2d   : > { %p774_p1 = scmp.lt.s32.totalorder %s559_s17, 3  ;;  %p775_p2 = scmp.ge.s32.totalorder %s559_s17, 1 }
  0x2f   : > { %p187_p5 = pnand %p775_p2, %p774_p1 }
  0x30   : > { %s695_s5 = sand.u32 (!%p187_p5), 1, %s543_s13  }
  0x31   : > { %190 = sbr.rel (%p187_p5) target bundleno = 211 (0xd3), region = 32  ;;  %s375_s7 = sshll.u32 (!%p187_p5), %s695_s5, 3 }
  0x32   : > { %s193_s11 = scalar_lea.sflag (!%p187_p5), [#allocation3], %s695_s5  ;;  %s196_s18 = scalar_lea.vmem (!%p187_p5), [#allocation2], %s375_s7 }
  0x38   : > { %530 = dma.done.wait (%p631_p8), %s193_s11, 128  }
  0x39   : > { %532 = vsyncadd (%p631_p8), %s193_s11, 4294967168  ;;  %p225_p9 = scmp.lt.s32.totalorder %s551_s15, 1  ;;  %v562_v0 = vmov 0   ;;  %v231_v4 = vld [vmem:[%s196_s18] sm:$0xff]  ;;  %s380_s24 = sshll.u32 %s551_s15, 7 }
  0x3a   : > { %446 = vset.pattern.permute.xlu0 %v562_v0  ;;  %s224_s23 = scalar_lea.vmem [#allocation5], %s375_s7  ;;  %s715_s4 = scalar_lea.hbm %s767_s3, %s380_s24 }
  0x3b   : > { %s226_s6 = scalar_select %p225_p9, %s551_s15, 1 }
  0x3c   : > { %s270_s28 = sshll.u32 %s224_s23, 4  ;;  %s256_s11 = scalar_lea.sflag [#allocation4], %s695_s5  ;;  %s717_s28 = int_to_ptr.vmem [resolvable:$true] %s270_s28 }
  0x3d   : > { %s227_s10 = scalar_lea.vmem %s765_s1, %s226_s6  ;;  %s230_s22 = scalar_lea.vmem %s766_s2, %s226_s6 }
  0x3e   : > { %v377_v1 = vld [vmem:[%s227_s10] ss:$0 sm:$0xff]  ;;  %s477_s6 = scalar_lea.vmem %s717_s28, 128  ;;  %p776_p11 = scmp.ne.s32.totalorder %s771_s25, 0 }
  0x3f   : > { %239 = vperm.xlu0 %446, %v377_v1   ;;  %v378_v2 = vld [vmem:[%s230_s22] ss:$0 sm:$0xff]  ;;  %p478_p8 = scmp.ne.s32.totalorder %s717_s28, %s477_s6  ;;  %s563_s15 = smov [#allocation5]  }
  0x40   : > { %s481_s7 = sshll.u32 %s563_s15, 4  ;;  %s482_s7 = int_to_ptr.vmem [resolvable:$false] %s481_s7 }
  0x41   : > { %p479_p0 = pnand %p478_p8, %p776_p11  ;;  %s483_s18 = scalar_lea.vmem %s482_s7, 256 }
  0x42   : > { %p484_p13 = scmp.lt.s32.totalorder %s717_s28, %s482_s7  ;;  %p485_p3 = scmp.lt.s32.totalorder %s483_s18, %s477_s6 }
  0x43   : > { %250 = vperm.xlu0 %446, %v378_v2   ;;  %p480_p7 = pneg %p479_p0 }
  0x44   : > { %p486_p6 = por %p485_p3, %p484_p13 }
  0x46   : > { %p487_p4 = pnand %p486_p6, %p480_p7 }
  0xbe   : > { %v240_v3 = vpop.permute.xlu0 %239 }
  0xbf   : > { %v242_v5 = vmul.f32 %v240_v3, %v231_v4 }
  0xc2   : > { %v251_v6 = vpop.permute.xlu0 %250 }
  0xc3   : > { %v253_v7 = vadd.f32 %v251_v6, %v242_v5 }
  0xc5   : > { %254 = vst [vmem:[%s224_s23] sm:$0xff] %v253_v7 }
  0xc6   : > { %490 = shalt.err (!%p487_p4)
}
  0xc7   : > { %s491_s5 = scalar_lea.hbm %s715_s4, 128  ;;  %s495_s10 = scalar_lea.hbm %s767_s3, 256 }
  0xc8   : > { %p492_p10 = scmp.ne.s32.totalorder %s715_s4, %s491_s5  ;;  %p496_p2 = scmp.lt.u32.totalorder %s715_s4, %s767_s3 }
  0xc9   : > { %p497_p5 = scmp.lt.u32.totalorder %s495_s10, %s491_s5  ;;  %p499_p8 = scmp.lt.u32.totalorder %s491_s5, %s715_s4 }
  0xca   : > { %p493_p12 = pnand %p492_p10, %p776_p11 }
  0xcb   : > { %p498_p9 = por %p497_p5, %p496_p2 }
  0xcc   : > { %p494_p1 = pneg %p493_p12 }
  0xcd   : > { %p500_p0 = por %p499_p8, %p498_p9 }
  0xcf   : > { %p501_p7 = pnand %p500_p0, %p494_p1 }
  0xd1   : > { %504 = shalt.err (!%p501_p7)
}
  0xd2   : > { %385 = dma.vmem_to_hbm [thread:$0]  (%p776_p11), %s717_s28, 128, %s715_s4, %s256_s11  }
  0xd3 PF: > { %s282_s22 = sand.u32 1, %s539_s12   ;;  %p777_p13 = scmp.ne.s32.totalorder %s772_s27, 0 }
  0xd4   : > { %p778_p3 = scmp.ge.s32.totalorder %s559_s17, 2  ;;  %s283_s24 = scalar_lea.sflag [#allocation4], %s282_s22 }
  0xd6   : > { %p392_p6 = pnand %p778_p3, %p777_p13 }
  0xd8   : > { %534 = dma.done.wait (!%p392_p6), %s283_s24, 128  }
  0xd9   : > { %536 = vsyncadd (!%p392_p6), %s283_s24, 4294967168  ;;  %s19_s17 = sadd.s32 1, %s559_s17   ;;  %s779_s12 = smov %s543_s13 }
  0xda   : > { %p16_p4 = scmp.ge.s32.totalorder %s19_s17, 4   ;;  %s780_s13 = smov %s547_s14 }
  0xdb   : > { %s781_s14 = smov %s640_s26  ;;  %s782_s15 = smov %s555_s16 }
  0xdc   : > { %s783_s16 = smov %s785_s20  ;;  %18 = sbr.rel (!%p16_p4) target bundleno = 6 (0x6), region = 83 }
  0xe3   :  { %288 = vsyncpa [#allocation3], 1 }
  0xe4   :  { %290 = vsyncpa [#allocation3 + $0x1], 1 }
  0xe5   :  { %291 = vsyncpa [#allocation4], 1 }
  0xe6   :  { %293 = vsyncpa [#allocation4 + $0x1], 1 }

</bundles_post_ra>
